<compile_context>
chip_gen: v7x
topology: tpu7x:2x2x1
jax: 0.10.0
libtpu: 0.0.40
codegen_flags: <defaults>
</compile_context>

<pallas_src>
import jax
import jax.numpy as jnp
from jax.experimental import pallas as pl
from jax.experimental.pallas import tpu as pltpu


def _swish_kernel(x_ref, o_ref):
    # Upcast to f32 for the transcendental (EUP); cast back on store.
    x = x_ref[...].astype(jnp.float32)
    o_ref[...] = (x * jax.nn.sigmoid(x)).astype(o_ref.dtype)


def swish(
    x: jax.Array,
    *,
    target_block_bytes: int = 6 * 1024 * 1024,   # f32-equivalent bytes per block
    min_pallas_elements: int = 1 << 16,
) -> jax.Array:
    """Elementwise swish. Accepts any shape (e.g. NCHW); returns same shape/dtype."""
    orig_shape = x.shape
    dtype = x.dtype
    n = x.size
    itemsize = jnp.dtype(dtype).itemsize

    # Tiny tensors: pallas_call launch + pipeline fill overhead dominates; the
    # fused XLA elementwise op is already optimal there.
    if n == 0 or n < min_pallas_elements:
        xf = x.astype(jnp.float32)
        return (xf * jax.nn.sigmoid(xf)).astype(dtype)

    # Sublane pack factor: 8 for 32-bit, 16 for 16-bit, 32 for 8-bit dtypes.
    sub = max(8, 32 // itemsize)

    # Widest lane dimension (multiple of 128, <= 1024) that divides the flat
    # size exactly -> zero-copy reshape, no padding.
    lanes = None
    for cand in (1024, 512, 256, 128):
        if n % cand == 0:
            lanes = cand
            break

    if lanes is not None:
        padded_n = n
        x2d = jnp.reshape(x, (padded_n // lanes, lanes))
    else:
        # Ragged size: pad the flat array up to the next multiple of 128 only
        # (< 128 pad elements). swish(0) = 0 and the tail is sliced off.
        lanes = 128
        padded_n = pl.cdiv(n, lanes) * lanes
        x_flat = jnp.pad(jnp.reshape(x, (-1,)), (0, padded_n - n))
        x2d = jnp.reshape(x_flat, (padded_n // lanes, lanes))

    rows = padded_n // lanes

    # Block budget in f32-equivalent elements: the kernel upcasts to f32, so
    # intermediates for half/quarter dtypes are sized as if the block were f32.
    target_elems = max(sub * lanes, target_block_bytes // 4)
    max_tile_rows = max(sub, (target_elems // lanes) // sub * sub)

    tile_rows = min(max_tile_rows, rows)
    tile_rows = max(sub, (tile_rows // sub) * sub)

    num_steps = pl.cdiv(rows, tile_rows)
    # Prefer >= 4 grid steps (>= 2 per TensorCore on v7x megacore) when there
    # is enough work, so each core keeps its prefetch/writeback overlapped.
    if num_steps < 4 and rows >= 4 * sub:
        tile_rows = max(sub, ((pl.cdiv(rows, 4) + sub - 1) // sub) * sub)
        num_steps = pl.cdiv(rows, tile_rows)
    # Best effort: an even step count balances the two v7x TensorCores.
    if num_steps > 1 and num_steps % 2 == 1:
        cand = max(sub, ((pl.cdiv(rows, num_steps + 1) + sub - 1) // sub) * sub)
        if cand <= rows and pl.cdiv(rows, cand) % 2 == 0:
            tile_rows = cand
            num_steps = pl.cdiv(rows, cand)
    # Single-step case: a full-dim block is always layout-legal.
    if num_steps == 1:
        tile_rows = rows

    grid = (num_steps,)

    out2d = pl.pallas_call(
        _swish_kernel,
        out_shape=jax.ShapeDtypeStruct((rows, lanes), dtype),
        grid_spec=pltpu.PrefetchScalarGridSpec(
            num_scalar_prefetch=0,
            grid=grid,
            in_specs=[pl.BlockSpec((tile_rows, lanes), lambda i: (i, 0))],
            out_specs=pl.BlockSpec((tile_rows, lanes), lambda i: (i, 0)),
        ),
        compiler_params=pltpu.CompilerParams(
            dimension_semantics=("parallel",),
            # 4 live I/O buffers (~24 MiB f32-equiv) + Mosaic scratch for the
            # elementwise intermediates; 48 MiB leaves headroom under v7x's
            # 64 MiB physical VMEM and covers v5e's small 16 MiB default.
            vmem_limit_bytes=48 * 1024 * 1024,
        ),
        cost_estimate=pl.CostEstimate(
            flops=4 * padded_n,
            transcendentals=padded_n,
            bytes_accessed=2 * padded_n * itemsize,
        ),
    )(x2d)

    if padded_n == n:
        return jnp.reshape(out2d, orig_shape)
    out_flat = jnp.reshape(out2d, (-1,))[:n]
    return jnp.reshape(out_flat, orig_shape)


if __name__ == "__main__":
    key = jax.random.PRNGKey(0)
    k1, k2, k3 = jax.random.split(key, 3)

    # 1) Canonical NCHW input (force the Pallas path; the default would
    #    short-circuit tensors this small to a fused XLA op).
    x = jax.random.normal(key, (2, 4, 16, 16), dtype=jnp.float32)
    out = jax.block_until_ready(swish(x, min_pallas_elements=0))
    ref = x * jax.nn.sigmoid(x)
    assert out.shape == x.shape and out.dtype == x.dtype
    assert jnp.allclose(out, ref, atol=1e-6, rtol=1e-6)

    # 2) Flat size divisible by 256 but not 1024 -> relaxed lane selection,
    #    multi-step grid and a masked partial trailing block.
    xm = jax.random.normal(k1, (2, 8, 28, 28), dtype=jnp.float32)
    outm = jax.block_until_ready(swish(xm, min_pallas_elements=0))
    refm = xm * jax.nn.sigmoid(xm)
    assert outm.shape == xm.shape and outm.dtype == xm.dtype
    assert jnp.allclose(outm, refm, atol=1e-6, rtol=1e-6)

    # 3) Ragged size (not divisible by 128) -> minimal-pad fallback path.
    xr = jax.random.normal(k2, (2, 3, 5, 7), dtype=jnp.float32)
    outr = jax.block_until_ready(swish(xr, min_pallas_elements=0))
    refr = xr * jax.nn.sigmoid(xr)
    assert outr.shape == xr.shape and outr.dtype == xr.dtype
    assert jnp.allclose(outr, refr, atol=1e-6, rtol=1e-6)

    # 4) bf16 input (f32 upcast inside the kernel, 16-row sublane pack).
    xb = jax.random.normal(k3, (2, 4, 16, 16), dtype=jnp.bfloat16)
    outb = jax.block_until_ready(swish(xb, min_pallas_elements=0))
    xbf = xb.astype(jnp.float32)
    refb = (xbf * jax.nn.sigmoid(xbf)).astype(jnp.bfloat16)
    assert outb.shape == xb.shape and outb.dtype == xb.dtype
    assert jnp.allclose(outb.astype(jnp.float32), refb.astype(jnp.float32),
                        atol=1e-2, rtol=1e-2)

    # 5) Default small-tensor short-circuit still matches.
    outs = jax.block_until_ready(swish(x))
    assert jnp.allclose(outs, ref, atol=1e-6, rtol=1e-6)

    print("KERNEL_OK")
</pallas_src>

<mosaic_0001>
module attributes {stable_mosaic.version = 11 : i64} {
  func.func @_swish_kernel(%arg0: i32, %arg1: memref<2x1024xf32, #tpu.memory_space<vmem>>, %arg2: memref<2x1024xf32, #tpu.memory_space<vmem>>) attributes {dimension_semantics = [#tpu.dimension_semantics<parallel>], iteration_bounds = array<i64: 1>, scalar_prefetch = 0 : i64, scratch_operands = 0 : i64, tpu.core_type = #tpu.core_type<tc>, window_params = [{transform_indices = @transform_0, window_bounds = array<i64: 2, 1024>}, {transform_indices = @transform_1, window_bounds = array<i64: 2, 1024>}]} {
    %c0 = arith.constant 0 : index
    %c0_0 = arith.constant 0 : index
    %0 = vector.load %arg1[%c0, %c0_0] : memref<2x1024xf32, #tpu.memory_space<vmem>>, vector<2x1024xf32>
    %1 = arith.negf %0 : vector<2x1024xf32>
    %2 = math.exp %1 : vector<2x1024xf32>
    %cst = arith.constant 1.000000e+00 : f32
    %3 = vector.broadcast %cst : f32 to vector<2x1024xf32>
    %4 = arith.addf %3, %2 : vector<2x1024xf32>
    %5 = arith.divf %3, %4 : vector<2x1024xf32>
    %6 = arith.mulf %0, %5 : vector<2x1024xf32>
    %c0_1 = arith.constant 0 : index
    %c0_2 = arith.constant 0 : index
    %7 = vector.load %arg2[%c0_1, %c0_2] : memref<2x1024xf32, #tpu.memory_space<vmem>>, vector<2x1024xf32>
    tpu.vector_store %arg2[%c0_1, %c0_2], %6 {strides = array<i32>} : memref<2x1024xf32, #tpu.memory_space<vmem>>, vector<2x1024xf32>,
    return
  }
  func.func @transform_0(%arg0: i32) -> (i32, i32) {
    %c0_i32 = arith.constant 0 : i32
    %c0_i32_0 = arith.constant 0 : i32
    return %arg0, %c0_i32 : i32, i32
  }
  func.func @transform_1(%arg0: i32) -> (i32, i32) {
    %c0_i32 = arith.constant 0 : i32
    %c0_i32_0 = arith.constant 0 : i32
    return %arg0, %c0_i32 : i32, i32
  }
}

</mosaic_0001>

<bundles_post_ra>
// kernel: tpu_custom_call.1
= control target key start
LH: loop header
LB: loop body
LE: loop exit
PB: predicated region body
PF: predicated region fallthrough
CT: control target
= control target key end

     0   :  { %6 = vsyncpa [#allocation3], 0  ;;  %s150_s0 = inlined_call_operand.hbm [shape: f32[2,1024], index: 0, kind: input, shape index: {}]   ;;  %s151_s1 = inlined_call_operand.hbm [shape: f32[2,1024], index: 1, kind: output, shape index: {}]  }
   0x1   :  { %7 = vsyncpa [#allocation4], 0  ;;  %s114_s6 = smov [#allocation2]   ;;  %s66_s10 = scalar_lea.hbm %s150_s0, 256 }
   0x2   :  { %s14_s7 = sshll.u32 %s114_s6, 4  ;;  %p67_p0 = scmp.ne.s32.totalorder %s150_s0, %s66_s10  ;;  %s15_s7 = int_to_ptr.vmem [resolvable:$true] %s14_s7 }
   0x3   :  { %p70_p1 = scmp.lt.u32.totalorder %s66_s10, %s150_s0 }
   0x5   :  { %p72_p2 = pnand %p70_p1, %p67_p0 }
   0x7   :  { %75 = shalt.err (!%p72_p2)
}
   0x8   :  { %s76_s15 = scalar_lea.vmem %s15_s7, 256  ;;  %p81_p4 = scmp.lt.s32.totalorder %s15_s7, %s15_s7 }
   0x9   :  { %p77_p3 = scmp.ne.s32.totalorder %s15_s7, %s76_s15  ;;  %p82_p5 = scmp.lt.s32.totalorder %s76_s15, %s76_s15 }
   0xb   :  { %p83_p6 = por %p82_p5, %p81_p4 }
   0xd   :  { %p84_p7 = pnand %p83_p6, %p77_p3 }
   0xf   :  { %87 = shalt.err (!%p84_p7)
}
  0x10   :  { %17 = dma.hbm_to_vmem [thread:$0]  %s150_s0, 256, %s15_s7, [#allocation3]  }
  0x11   :  { %110 = dma.done.wait [#allocation3], 256  }
  0x12   :  { %111 = vsyncadd [#allocation3], 4294967040  ;;  %v21_v0 = vld [vmem:[#allocation2] sm:$0xff]  ;;  %v22_v1 = vld [vmem:[#allocation2 + $0x8] sm:$0xff]  ;;  %s115_s18 = smov [#allocation5]  }
  0x13   :  { %v54_v2 = vmul.f32 -1.442695, %v21_v0  ;;  %v55_v3 = vmul.f32 -1.442695, %v22_v1  ;;  %s45_s19 = sshll.u32 %s115_s18, 4  ;;  %s46_s19 = int_to_ptr.vmem [resolvable:$true] %s45_s19 }
  0x14   :  { %s88_s0 = scalar_lea.vmem %s46_s19, 256  ;;  %p93_p9 = scmp.lt.s32.totalorder %s46_s19, %s46_s19 }
  0x15   :  { %58 = vpow2.f32 %v54_v2  ;;  %p89_p8 = scmp.ne.s32.totalorder %s46_s19, %s88_s0  ;;  %p94_p10 = scmp.lt.s32.totalorder %s88_s0, %s88_s0 }
  0x16   :  { %60 = vpow2.f32 %v55_v3 }
  0x17   :  { %p95_p11 = por %p94_p10, %p93_p9 }
  0x19   :  { %p96_p12 = pnand %p95_p11, %p89_p8 }
  0x1f   :  { %v59_v4 = vpop.eup %58 }
  0x20   :  { %v61_v5 = vpop.eup %60  ;;  %v29_v6 = vadd.f32 1.0, %v59_v4 }
  0x21   :  { %v30_v7 = vadd.f32 1.0, %v61_v5 }
  0x22   :  { %62 = vrcp.f32 %v29_v6 }
  0x23   :  { %64 = vrcp.f32 %v30_v7 }
  0x2c   :  { %v63_v8 = vpop.eup %62 }
  0x2d   :  { %v65_v9 = vpop.eup %64  ;;  %v35_v10 = vmul.f32 %v63_v8, %v21_v0 }
  0x2e   :  { %v36_v11 = vmul.f32 %v65_v9, %v22_v1 }
  0x2f   :  { %37 = vst [vmem:[#allocation5] sm:$0xff] %v35_v10 }
  0x30   :  { %38 = vst [vmem:[#allocation5 + $0x8] sm:$0xff] %v36_v11 }
  0x31   :  { %99 = shalt.err (!%p96_p12)
}
  0x32   :  { %s100_s22 = scalar_lea.hbm %s151_s1, 256 }
  0x33   :  { %p101_p13 = scmp.ne.s32.totalorder %s151_s1, %s100_s22  ;;  %p104_p0 = scmp.lt.u32.totalorder %s100_s22, %s151_s1 }
  0x35   :  { %p106_p1 = pnand %p104_p0, %p101_p13 }
  0x37   :  { %109 = shalt.err (!%p106_p1)
}
  0x38   :  { %48 = dma.vmem_to_hbm [thread:$0]  %s46_s19, 256, %s151_s1, [#allocation4]  }
  0x39   :  { %112 = dma.done.wait [#allocation4], 256  }
  0x3a   :  { %113 = vsyncadd [#allocation4], 4294967040 }
  0x3b   :  { %52 = vsyncpa [#allocation3], 1 }
  0x3c   :  { %53 = vsyncpa [#allocation4], 1 }

</bundles_post_ra>
